<compile_context>
chip_gen: v6e
topology: v6e:2x2x1
jax: 0.10.0
libtpu: 0.0.40
codegen_flags: <defaults>
</compile_context>

<pallas_src>
import functools
import math

import jax
import jax.numpy as jnp
from jax import lax
from jax.experimental import pallas as pl
from jax.experimental.pallas import tpu as pltpu


def _round_up(x, m):
    return ((x + m - 1) // m) * m


# ---------------------------------------------------------------------------
# Fast path: whole embedding table resident in VMEM, chunked token grid,
# in-kernel gather via dynamic row loads from the VMEM table.
# ---------------------------------------------------------------------------
def _embed_vmem_kernel(ids_sref, table_ref, out_ref, *, scale, chunk):
    # ids_sref : (N_pad,) int32 in SMEM (scalar-prefetched token ids)
    # table_ref: (vocab, d_model) f32, resident in VMEM (constant index_map)
    # out_ref  : (chunk, d_model) f32 output tile (lane-dense, sublane-dense)
    base = pl.program_id(0) * chunk

    def body(j, carry):
        idx = ids_sref[base + j]                      # scalar token id from SMEM
        row = table_ref[pl.ds(idx, 1), :]             # (1, d_model) dynamic row load
        out_ref[pl.ds(j, 1), :] = row * scale         # single VPU multiply per element
        return carry

    lax.fori_loop(0, chunk, body, 0)


def _input_embedding_table_in_vmem(flat_ids, emb_table, *, chunk, vmem_limit):
    n_pad = flat_ids.shape[0]
    vocab, d_model = emb_table.shape
    num_chunks = n_pad // chunk
    scale = math.sqrt(d_model)

    kernel = functools.partial(_embed_vmem_kernel, scale=scale, chunk=chunk)

    return pl.pallas_call(
        kernel,
        out_shape=jax.ShapeDtypeStruct((n_pad, d_model), emb_table.dtype),
        grid_spec=pltpu.PrefetchScalarGridSpec(
            num_scalar_prefetch=1,                    # flat ids -> SMEM
            grid=(num_chunks,),
            in_specs=[
                # Full table, constant index_map -> DMA'd from HBM once, stays in VMEM.
                pl.BlockSpec((vocab, d_model), lambda i, ids: (0, 0)),
            ],
            out_specs=pl.BlockSpec((chunk, d_model), lambda i, ids: (i, 0)),
        ),
        compiler_params=pltpu.CompilerParams(
            dimension_semantics=("parallel",),        # chunks independent (v7x: 2 TCs)
            vmem_limit_bytes=vmem_limit,
        ),
    )(flat_ids, emb_table)


# ---------------------------------------------------------------------------
# Fallback path (table does not fit VMEM budget): scalar-prefetch-driven
# per-row BlockSpec gather from HBM, with deeper pipelining to hide DMA latency.
# ---------------------------------------------------------------------------
def _embed_row_kernel(ids_sref, row_ref, out_ref, *, scale):
    out_ref[...] = row_ref[...] * scale


def _input_embedding_row_gather(flat_ids, emb_table, *, vmem_limit):
    n = flat_ids.shape[0]
    vocab, d_model = emb_table.shape
    scale = math.sqrt(d_model)

    kernel = functools.partial(_embed_row_kernel, scale=scale)

    return pl.pallas_call(
        kernel,
        out_shape=jax.ShapeDtypeStruct((n, d_model), emb_table.dtype),
        grid_spec=pltpu.PrefetchScalarGridSpec(
            num_scalar_prefetch=1,
            grid=(n,),
            in_specs=[
                pl.BlockSpec((1, d_model), lambda i, ids: (ids[i], 0),
                             pipeline_mode=pl.Buffered(4)),
            ],
            out_specs=pl.BlockSpec((1, d_model), lambda i, ids: (i, 0)),
        ),
        compiler_params=pltpu.CompilerParams(
            dimension_semantics=("arbitrary",),
            vmem_limit_bytes=vmem_limit,
        ),
    )(flat_ids, emb_table)


# ---------------------------------------------------------------------------
# Public wrapper: matches InputEmbedding.forward semantics.
# ---------------------------------------------------------------------------
def input_embedding(ids, emb_table, *, chunk_tokens=256):
    """ids: (B, S) int; emb_table: (vocab, d_model) f32 -> (B, S, d_model) f32."""
    B, S = ids.shape
    vocab, d_model = emb_table.shape
    N = B * S

    # Clamp so an out-of-range id can never drive an OOB table read.
    flat_ids = jnp.clip(ids.reshape(N).astype(jnp.int32), 0, vocab - 1)

    itemsize = jnp.dtype(emb_table.dtype).itemsize
    table_bytes = vocab * d_model * itemsize

    try:
        vmem_cap = int(pltpu.get_tpu_info().vmem_capacity_bytes)
    except Exception:
        vmem_cap = 64 * 1024 * 1024   # conservative default (v7x per-core VMEM)

    # Token chunk per grid step: multiple of 8 sublanes, lane-dense output block.
    chunk = min(chunk_tokens, _round_up(N, 8))
    chunk = max(8, _round_up(chunk, 8))
    n_pad = _round_up(N, chunk)
    if n_pad != N:
        flat_ids = jnp.pad(flat_ids, (0, n_pad - N))   # pad with id 0 (valid after clamp)

    # Budget gate for the table-in-VMEM fast path (leave room for pipelined out tiles).
    chunk_io_bytes = 4 * chunk * d_model * itemsize
    budget = vmem_cap // 2            # ~32 MiB on v7x, ~64 MiB on v5e/v6e

    if table_bytes + chunk_io_bytes <= budget:
        needed = table_bytes + chunk_io_bytes + (4 << 20)
        vmem_limit = int(min(vmem_cap - (8 << 20), max(needed, 32 << 20)))
        out_flat = _input_embedding_table_in_vmem(
            flat_ids, emb_table, chunk=chunk, vmem_limit=vmem_limit)
    else:
        vmem_limit = int(min(vmem_cap - (8 << 20), 64 << 20))
        out_flat = _input_embedding_row_gather(
            flat_ids, emb_table, vmem_limit=vmem_limit)

    return out_flat[:N].reshape(B, S, d_model)


if __name__ == "__main__":
    # Small deterministic setup consistent with the module's forward.
    d_model = 128
    vocab_size = 64
    batch, seq = 2, 8

    key = jax.random.PRNGKey(0)
    k_ids, k_emb = jax.random.split(key)

    ids = jax.random.randint(k_ids, (batch, seq), 0, vocab_size, dtype=jnp.int32)
    emb_table = jax.random.normal(k_emb, (vocab_size, d_model), dtype=jnp.float32)

    out = input_embedding(ids, emb_table)
    out = jax.block_until_ready(out)

    # Reference: plain JAX gather + scale (== PyTorch embedding(x) * sqrt(d_model)).
    ref = jnp.take(emb_table, ids, axis=0) * math.sqrt(d_model)
    assert out.shape == (batch, seq, d_model)
    assert jnp.allclose(out, ref, atol=1e-5, rtol=1e-5)

    print("KERNEL_OK")
</pallas_src>

<mosaic_0001>
module attributes {stable_mosaic.version = 11 : i64} {
  func.func @_embed_vmem_kernel(%arg0: i32, %arg1: memref<16xi32, #tpu.memory_space<smem>>, %arg2: memref<64x128xf32, #tpu.memory_space<vmem>>, %arg3: memref<16x128xf32, #tpu.memory_space<vmem>>) attributes {dimension_semantics = [#tpu.dimension_semantics<parallel>], iteration_bounds = array<i64: 1>, scalar_prefetch = 1 : i64, scratch_operands = 0 : i64, tpu.core_type = #tpu.core_type<tc>, window_params = [{pipeline_mode = #tpu.pipeline_mode<synchronous>, transform_indices = @transform_0, window_bounds = array<i64: 64, 128>}, {transform_indices = @transform_1, window_bounds = array<i64: 16, 128>}]} {
    %c16_i32 = arith.constant 16 : i32
    %0 = arith.muli %arg0, %c16_i32 : i32
    %c0_i32 = arith.constant 0 : i32
    %c16_i32_0 = arith.constant 16 : i32
    %1 = arith.addi %c0_i32, %c16_i32_0 : i32
    %c1_i32 = arith.constant 1 : i32
    scf.for %arg4 = %c0_i32 to %1 step %c1_i32  : i32 {
      %2 = arith.addi %0, %arg4 : i32
      %3 = arith.index_cast %2 : i32 to index
      %4 = memref.load %arg1[%3] : memref<16xi32, #tpu.memory_space<smem>>
      %5 = arith.index_cast %4 : i32 to index
      %c0 = arith.constant 0 : index
      %6 = vector.load %arg2[%5, %c0] : memref<64x128xf32, #tpu.memory_space<vmem>>, vector<1x128xf32>
      %cst = arith.constant 11.3137083 : f32
      %7 = vector.broadcast %cst : f32 to vector<1x128xf32>
      %8 = arith.mulf %6, %7 : vector<1x128xf32>
      %9 = arith.index_cast %arg4 : i32 to index
      %c0_2 = arith.constant 0 : index
      %10 = vector.load %arg3[%9, %c0_2] : memref<16x128xf32, #tpu.memory_space<vmem>>, vector<1x128xf32>
      tpu.vector_store %arg3[%9, %c0_2], %8 {strides = array<i32>} : memref<16x128xf32, #tpu.memory_space<vmem>>, vector<1x128xf32>,
    }
    %c16_i32_1 = arith.constant 16 : i32
    return
  }
  func.func @transform_0(%arg0: i32, %arg1: memref<16xi32, #tpu.memory_space<smem>>) -> (i32, i32) {
    %c0_i32 = arith.constant 0 : i32
    %c0_i32_0 = arith.constant 0 : i32
    %c0_i32_1 = arith.constant 0 : i32
    return %c0_i32, %c0_i32_0 : i32, i32
  }
  func.func @transform_1(%arg0: i32, %arg1: memref<16xi32, #tpu.memory_space<smem>>) -> (i32, i32) {
    %c0_i32 = arith.constant 0 : i32
    %c0_i32_0 = arith.constant 0 : i32
    return %arg0, %c0_i32 : i32, i32
  }
}

</mosaic_0001>

<bundles_post_ra>
// kernel: tpu_custom_call.1
= control target key start
LH: loop header
LB: loop body
LE: loop exit
PB: predicated region body
PF: predicated region fallthrough
CT: control target
= control target key end

     0   :  { %s141_s9 = smov [#allocation3]   ;;  %s176_s0 = inlined_call_operand.hbm [shape: s32[16], index: 0, kind: input, shape index: {}]   ;;  %s177_s1 = inlined_call_operand.hbm [shape: f32[64,128], index: 1, kind: input, shape index: {}]   ;;  %s178_s2 = inlined_call_operand.hbm [shape: f32[16,128], index: 2, kind: output, shape index: {}]  }
   0x1   :  { %8 = dma.hbm_to_smem %s176_s0, 16, %s141_s9, [#allocation2] }
   0x2   :  { %131 = dma.done.wait [#allocation2], 16 }
   0x3   :  { %132 = vsyncadd [#allocation2], 4294967280 }
   0x4   :  { %10 = sfence }
   0x5   :  { %11 = vsyncpa [#allocation5], 0 }
   0x6   :  { %12 = vsyncpa [#allocation6], 0  ;;  %s142_s12 = smov [#allocation4]  }
   0x7   :  { %s18_s13 = sshll.u32 %s142_s12, 4  ;;  %s19_s13 = int_to_ptr.vmem [resolvable:$true] %s18_s13 }
   0x8   :  { %s95_s14 = scalar_lea.vmem %s19_s13, 1024  ;;  %p100_p1 = scmp.lt.s32.totalorder %s19_s13, %s19_s13 }
   0x9   :  { %p96_p0 = scmp.ne.s32.totalorder %s19_s13, %s95_s14  ;;  %p101_p2 = scmp.lt.s32.totalorder %s95_s14, %s95_s14 }
   0xb   :  { %p102_p3 = por %p101_p2, %p100_p1 }
   0xd   :  { %p103_p4 = pnand %p102_p3, %p96_p0 }
   0xf   :  { %106 = shalt.err (!%p103_p4)
}
  0x10   :  { %s143_s15 = smov 128   ;;  %s144_s16 = smov 8  }
  0x11   :  { %24 = dma.hbm_to_vmem [thread:$0]  %s177_s1, 1024, %s19_s13, [#allocation5], %s143_s15, %s143_s15, %s144_s16  }
  0x12   :  { %133 = dma.done.wait [#allocation5], 1024  }
  0x13   :  { %134 = vsyncadd [#allocation5], 4294966272  ;;  %s137_s18 = smov 0  }
  0x14 LB: > { %s36_s19 = sld [smem:[#allocation3 + %s139_s18]]  ;;  %s40_s21 = scalar_lea.vmem [#allocation7], %s139_s18  ;;  %s139_s18 = sphi %s137_s18, %s34_s18  }
  0x15   : > { %s34_s18 = sadd.s32 1, %s139_s18  }
  0x16   : > { %p31_p5 = scmp.ge.s32.totalorder %s34_s18, 16  }
  0x17   :  { %s145_s22 = smov (%p31_p5), [#allocation7]  }
  0x18   :  { %s47_s23 = sshll.u32 (%p31_p5), %s145_s22, 4  ;;  %s48_s23 = int_to_ptr.vmem [resolvable:$true] %s47_s23 }
  0x19   :  { %s107_s1 = scalar_lea.vmem (%p31_p5), %s48_s23, 256  ;;  %p112_p7 = scmp.lt.s32.totalorder (%p31_p5), %s48_s23, %s48_s23 }
  0x1a   : > { %s37_s20 = scalar_lea.vmem [#allocation4], %s36_s19  ;;  %33 = sbr.rel (!%p31_p5) target bundleno = 20 (0x14), region = 37 }
  0x1b   : > { %v38_v0 = vld [vmem:[%s37_s20] sm:$0x1]  ;;  %p108_p6 = scmp.ne.s32.totalorder (%p31_p5), %s48_s23, %s107_s1  ;;  %p113_p8 = scmp.lt.s32.totalorder (%p31_p5), %s107_s1, %s107_s1 }
  0x1c   : > { %v39_v1 = vmul.f32 11.313708, %v38_v0 }
  0x1d   :  { %p114_p9 = por (%p31_p5), %p113_p8, %p112_p7 }
  0x1e   : > { %41 = vst [vmem:[%s40_s21] sm:$0x1] %v39_v1 }
  0x1f   :  { %p115_p10 = pnand %p114_p9, %p108_p6 }
  0x21   :  { %118 = shalt.err (!%p115_p10)
}
  0x22   :  { %53 = dma.vmem_to_hbm [thread:$0]  %s48_s23, 256, %s178_s2, [#allocation6], %s143_s15, %s143_s15, %s144_s16  }
  0x23   :  { %135 = dma.done.wait [#allocation6], 256  }
  0x24   :  { %136 = vsyncadd [#allocation6], 4294967040 }
  0x25   :  { %57 = vsyncpa [#allocation5], 1 }
  0x26   :  { %58 = vsyncpa [#allocation6], 1 }

</bundles_post_ra>
